<compile_context>
chip_gen: v7x
topology: tpu7x:2x2x1
jax: 0.10.0
libtpu: 0.0.40
codegen_flags: <defaults>
</compile_context>

<pallas_src>
import functools
import numpy as np
import jax
import jax.numpy as jnp
from jax.experimental import pallas as pl
from jax.experimental.pallas import tpu as pltpu


def _mapping_kernel(*refs, num_layers, leaky):
    """refs = (z^T tile, W_0, b_0, W_1, b_1, ..., out^T tile).

    All activations stay transposed: features on sublanes, the batch tile on the
    128-wide lane axis, so every intermediate/output store is lane-dense and each
    dot is a (cout x cin) @ (cin x TB) MXU GEMM with N = TB.
    """
    zT_ref = refs[0]
    o_ref = refs[-1]
    h = zT_ref[...]
    for i in range(num_layers):
        w_ref = refs[1 + 2 * i]                 # (cout, cin)
        b_ref = refs[2 + 2 * i]                 # (cout, 1) -> broadcast over lanes
        h = jnp.dot(w_ref[...], h, preferred_element_type=jnp.float32) + b_ref[...]
        if leaky:
            h = jnp.where(h >= 0.0, h, 0.2 * h)
    o_ref[...] = h.astype(o_ref.dtype)


def mapping_network(z, params, channels_list, *, activation="linear",
                    lr_mul=0.01, eps=1e-8, max_batch_tile=1024,
                    compute_dtype=jnp.float32, use_core_parallel=False,
                    z_pipeline_buffers=None):
    """z: (B, channels_list[0]) -> (B, channels_list[-1])."""
    B, M = z.shape
    assert M == channels_list[0], "latent dim must equal channels_list[0]"
    num_layers = len(channels_list) - 1
    c_out = channels_list[-1]

    # ---- parameter-only preprocessing (batch-invariant glue, hoisted out of kernel) ----
    d = jnp.abs(params["diagonal_params"].astype(jnp.float32)) + eps
    # TODO(synk): QR has no clean Pallas equivalent; computed with jnp.linalg.qr (XLA).
    Q, _ = jnp.linalg.qr(jnp.tanh(params["basis_params"].astype(jnp.float32)))
    L = Q * d[None, :]                                   # (M, M); per-row x = L @ z_row

    Ws, bs = [], []
    for i in range(num_layers):
        c = 1.0 / np.sqrt(channels_list[i]) * lr_mul     # EqualizedWeight scale, folded
        Ws.append(params["mlp_w"][i].astype(jnp.float32) * c)        # (cout, cin)
        bs.append(params["mlp_b"][i].astype(jnp.float32) * lr_mul)   # (cout,)

    leaky = (activation == "lrelu")
    if leaky:
        # Nonlinearity between layers: only L can be folded (into layer 0).
        layer_Ws = [Ws[0] @ L] + Ws[1:]
        layer_bs = list(bs)
    else:
        # Default 'linear' activation: fold L and EVERY layer into one matrix + bias,
        # so the kernel is a single GEMM + bias.
        W_all, b_all = L, jnp.zeros((M,), jnp.float32)
        for i in range(num_layers):
            W_all = Ws[i] @ W_all
            b_all = Ws[i] @ b_all + bs[i]
        layer_Ws, layer_bs = [W_all], [b_all]
    kernel_layers = len(layer_Ws)

    # ---- transposed, lane-dense dataflow: batch lives on the 128-lane axis ------------
    zT = z.astype(jnp.float32).T                         # (M, B)
    if B <= max_batch_tile:
        TB, Bp = B, B                                    # whole batch in one block
    else:
        TB = max_batch_tile                              # multiple of 128 -> lane-dense
        Bp = pl.cdiv(B, TB) * TB
    if Bp != B:
        zT = jnp.pad(zT, ((0, 0), (0, Bp - B)))
    zT = zT.astype(compute_dtype)
    n_steps = Bp // TB
    if n_steps > 1:
        assert TB % 128 == 0, "batch tile must be a multiple of 128 when tiling"

    z_spec_kwargs = {}
    if z_pipeline_buffers is not None and n_steps > 1:
        # Deeper pipelining on the z stream if a profile shows exposed DMA.
        z_spec_kwargs = dict(pipeline_mode=pl.Buffered(z_pipeline_buffers))

    in_specs = [pl.BlockSpec((M, TB), lambda i: (0, i), **z_spec_kwargs)]
    operands = [zT]
    for li in range(kernel_layers):
        cout, cin = layer_Ws[li].shape
        in_specs.append(pl.BlockSpec((cout, cin), lambda i: (0, 0)))   # grid-invariant W
        in_specs.append(pl.BlockSpec((cout, 1), lambda i: (0, 0)))     # grid-invariant b
        operands.append(layer_Ws[li].astype(compute_dtype))
        operands.append(layer_bs[li].reshape(-1, 1))                   # bias stays f32

    # On v7x only CORE_PARALLEL actually splits the batch grid across the 2 TensorCores;
    # plain "parallel" is kept as the safe default for single-core v5e/v6e.
    dims = (pltpu.CORE_PARALLEL,) if use_core_parallel else ("parallel",)

    kernel = functools.partial(_mapping_kernel, num_layers=kernel_layers, leaky=leaky)
    outT = pl.pallas_call(
        kernel,
        out_shape=jax.ShapeDtypeStruct((c_out, Bp), jnp.float32),
        grid=(n_steps,),
        in_specs=in_specs,
        out_specs=pl.BlockSpec((c_out, TB), lambda i: (0, i)),
        compiler_params=pltpu.CompilerParams(dimension_semantics=dims),
    )(*operands)

    return outT[:, :B].T                                 # back to (B, c_out)


def _reference(z, params, channels_list, *, activation="linear", lr_mul=0.01, eps=1e-8):
    """Pure-JAX reference mirroring the PyTorch MappingNetwork forward."""
    d = jnp.abs(params["diagonal_params"]) + eps
    Q, _ = jnp.linalg.qr(jnp.tanh(params["basis_params"]))
    L = Q * d[None, :]                                   # Bq @ diag(d)
    x = z @ L.T                                          # bmm(L, z[:, :, None]).squeeze
    for i in range(len(channels_list) - 1):
        c = 1.0 / np.sqrt(channels_list[i]) * lr_mul
        x = x @ (params["mlp_w"][i] * c).T + params["mlp_b"][i] * lr_mul
        if activation == "lrelu":
            x = jnp.where(x >= 0.0, x, 0.2 * x)
    return x


if __name__ == "__main__":
    # Keep XLA reference / wrapper-fold matmuls in full f32 to match the kernel's f32 path.
    jax.config.update("jax_default_matmul_precision", "highest")

    channels_list = [32, 48, 32]            # matrix_size = 32, 2 EqualizedLinear layers
    M = channels_list[0]
    num_layers = len(channels_list) - 1

    key = jax.random.PRNGKey(0)
    ks = jax.random.split(key, 4 + 2 * num_layers)

    params = {
        "diagonal_params": jax.random.normal(ks[0], (M,), jnp.float32),
        "basis_params": jax.random.normal(ks[1], (M, M), jnp.float32),
        "mlp_w": [],
        "mlp_b": [],
    }
    for i in range(num_layers):
        cin, cout = channels_list[i], channels_list[i + 1]
        params["mlp_w"].append(jax.random.normal(ks[2 + 2 * i], (cout, cin), jnp.float32))
        params["mlp_b"].append(jax.random.normal(ks[3 + 2 * i], (cout,), jnp.float32) * 0.5)

    # Small single-block batch, plus a batch that exercises the 128-row tiled/padded path.
    z_small = jax.random.normal(ks[-2], (8, M), jnp.float32)
    z_tiled = jax.random.normal(ks[-1], (300, M), jnp.float32)

    for act in ("linear", "lrelu"):         # module default is 'linear'; also check lrelu
        for zz, tile in ((z_small, 1024), (z_tiled, 128)):
            out = mapping_network(zz, params, channels_list, activation=act,
                                  max_batch_tile=tile)
            out = jax.block_until_ready(out)
            ref = _reference(zz, params, channels_list, activation=act)
            assert out.shape == (zz.shape[0], channels_list[-1])
            assert np.allclose(np.asarray(out), np.asarray(ref), atol=1e-4, rtol=1e-4), \
                f"Pallas output mismatch vs reference (activation={act}, B={zz.shape[0]})"

    print("KERNEL_OK")
</pallas_src>

<mosaic_0001>
module attributes {stable_mosaic.version = 11 : i64} {
  func.func @_mapping_kernel(%arg0: i32, %arg1: memref<32x8xf32, #tpu.memory_space<vmem>>, %arg2: memref<32x32xf32, #tpu.memory_space<vmem>>, %arg3: memref<32x1xf32, #tpu.memory_space<vmem>>, %arg4: memref<32x8xf32, #tpu.memory_space<vmem>>) attributes {dimension_semantics = [#tpu.dimension_semantics<parallel>], iteration_bounds = array<i64: 1>, scalar_prefetch = 0 : i64, scratch_operands = 0 : i64, tpu.core_type = #tpu.core_type<tc>, window_params = [{transform_indices = @transform_0, window_bounds = array<i64: 32, 8>}, {pipeline_mode = #tpu.pipeline_mode<synchronous>, transform_indices = @transform_1, window_bounds = array<i64: 32, 32>}, {pipeline_mode = #tpu.pipeline_mode<synchronous>, transform_indices = @transform_2, window_bounds = array<i64: 32, 1>}, {transform_indices = @transform_3, window_bounds = array<i64: 32, 8>}]} {
    %c0 = arith.constant 0 : index
    %c0_0 = arith.constant 0 : index
    %0 = vector.load %arg1[%c0, %c0_0] : memref<32x8xf32, #tpu.memory_space<vmem>>, vector<32x8xf32>
    %c0_1 = arith.constant 0 : index
    %c0_2 = arith.constant 0 : index
    %1 = vector.load %arg2[%c0_1, %c0_2] : memref<32x32xf32, #tpu.memory_space<vmem>>, vector<32x32xf32>
    %cst = arith.constant dense<0.000000e+00> : vector<32x8xf32>
    %2 = tpu.matmul %1, %0, %cst {dimension_numbers = #tpu.dot_dimension_numbers<[1], [0], [0], [1], [0, 0, 1, 1], [], []>, precision = #tpu.contract_precision<fp32>} : vector<32x32xf32>, vector<32x8xf32>, vector<32x8xf32> -> vector<32x8xf32>
    %c0_3 = arith.constant 0 : index
    %c0_4 = arith.constant 0 : index
    %3 = vector.load %arg3[%c0_3, %c0_4] : memref<32x1xf32, #tpu.memory_space<vmem>>, vector<32x1xf32>
    %4 = vector.broadcast %3 : vector<32x1xf32> to vector<32x8xf32>
    %5 = arith.addf %2, %4 : vector<32x8xf32>
    %c0_5 = arith.constant 0 : index
    %c0_6 = arith.constant 0 : index
    %6 = vector.load %arg4[%c0_5, %c0_6] : memref<32x8xf32, #tpu.memory_space<vmem>>, vector<32x8xf32>
    tpu.vector_store %arg4[%c0_5, %c0_6], %5 {strides = array<i32>} : memref<32x8xf32, #tpu.memory_space<vmem>>, vector<32x8xf32>,
    return
  }
  func.func @transform_0(%arg0: i32) -> (i32, i32) {
    %c0_i32 = arith.constant 0 : i32
    %c0_i32_0 = arith.constant 0 : i32
    return %c0_i32, %arg0 : i32, i32
  }
  func.func @transform_1(%arg0: i32) -> (i32, i32) {
    %c0_i32 = arith.constant 0 : i32
    %c0_i32_0 = arith.constant 0 : i32
    %c0_i32_1 = arith.constant 0 : i32
    return %c0_i32, %c0_i32_0 : i32, i32
  }
  func.func @transform_2(%arg0: i32) -> (i32, i32) {
    %c0_i32 = arith.constant 0 : i32
    %c0_i32_0 = arith.constant 0 : i32
    %c0_i32_1 = arith.constant 0 : i32
    return %c0_i32, %c0_i32_0 : i32, i32
  }
  func.func @transform_3(%arg0: i32) -> (i32, i32) {
    %c0_i32 = arith.constant 0 : i32
    %c0_i32_0 = arith.constant 0 : i32
    return %c0_i32, %arg0 : i32, i32
  }
}

</mosaic_0001>

<bundles_post_ra>
// kernel: tpu_custom_call.1
= control target key start
LH: loop header
LB: loop body
LE: loop exit
PB: predicated region body
PF: predicated region fallthrough
CT: control target
= control target key end

     0   :  { %vm46_vm0 = vcmask 261120   ;;  %v889_v3 = vmov 0   ;;  %vm673_vm1 = vcmask 64512   ;;  %s1036_s0 = inlined_call_operand.vmem [shape: f32[32,8], index: 0, kind: input, shape index: {}]   ;;  %s1037_s1 = inlined_call_operand.vmem [shape: f32[32,32], index: 1, kind: input, shape index: {}]   ;;  %s1038_s2 = inlined_call_operand.vmem [shape: f32[32,1], index: 2, kind: input, shape index: {}]   ;;  %s1039_s3 = inlined_call_operand.vmem [shape: f32[32,8], index: 3, kind: output, shape index: {}]  }
   0x1   :  { %v14_v0 = vld [vmem:[%s1036_s0] sm:$0xff]  ;;  %v15_v1 = vld [vmem:[%s1036_s0 + $0x8] sm:$0xff]  ;;  %v16_v2 = vld [vmem:[%s1036_s0 + $0x10] sm:$0xff]  ;;  %887 = vset.pattern.permute.xlu0 %v889_v3  ;;  %888 = vset.pattern.permute.xlu1 %v889_v3 }
   0x2   :  { %v60_v4 = vand.u32 4294901760, %v14_v0  ;;  %v63_v5 = vand.u32 4294901760, %v15_v1  ;;  %v17_v6 = vld [vmem:[%s1036_s0 + $0x18] sm:$0xff]  ;;  %v66_v7 = vand.u32 4294901760, %v16_v2  ;;  %v18_v8 = vld [vmem:[%s1037_s1] sm:$0xff]  ;;  %v19_v9 = vld [vmem:[%s1037_s1 + $0x8] sm:$0xff] }
   0x3   :  { %v69_v10 = vand.u32 4294901760, %v17_v6  ;;  %v48_v11 = vsel %vm46_vm0, %v18_v8, 0  ;;  %v51_v12 = vsel %vm46_vm0, %v19_v9, 0  ;;  %v20_v13 = vld [vmem:[%s1037_s1 + $0x10] sm:$0xff]  ;;  %v21_v14 = vld [vmem:[%s1037_s1 + $0x18] sm:$0xff]  ;;  %v22_v15 = vld [vmem:[%s1038_s2] sm:$0xff] }
   0x4   :  { %v939_v16 = vpack.c.bf16 %v63_v5, %v60_v4  ;;  %v941_v17 = vand.u32 4294901760, %v48_v11  ;;  %v943_v18 = vand.u32 4294901760, %v51_v12  ;;  %v945_v19 = vsub.f32 %v14_v0, %v60_v4  ;;  %28 = vperm.xlu0 %887, %v22_v15   ;;  %v24_v20 = vld [vmem:[%s1038_s2 + $0x10] sm:$0xff]  ;;  %v23_v29 = vld [vmem:[%s1038_s2 + $0x8] sm:$0xff]  ;;  %v25_v30 = vld [vmem:[%s1038_s2 + $0x18] sm:$0xff] }
   0x5   :  { %v950_v21 = vpack.c.bf16 %v69_v10, %v66_v7  ;;  %v952_v22 = vsub.f32 %v15_v1, %v63_v5  ;;  %v54_v23 = vsel %vm46_vm0, %v20_v13, 0  ;;  %v57_v24 = vsel %vm46_vm0, %v21_v14, 0  ;;  %38 = vperm.xlu1 %888, %v24_v20  }
   0x6   :  { %815 = vmatprep.subr.bf16.mxu1 %v939_v16  ;;  %839 = vmatprep.subr.bf16.mxu0 %v939_v16  ;;  %v959_v25 = vsub.f32 %v48_v11, %v941_v17  ;;  %v962_v26 = vsub.f32 %v51_v12, %v943_v18  ;;  %v171_v27 = vand.u32 4294901760, %v945_v19  ;;  %v965_v28 = vand.u32 4294901760, %v54_v23 }
   0x7   :  { %817 = vmatpush3.bf16.msra.mxu1 %v939_v16  ;;  %841 = vmatpush3.bf16.msra.mxu0 %v939_v16  ;;  %v178_v31 = vand.u32 4294901760, %v952_v22  ;;  %v976_v32 = vand.u32 4294901760, %v57_v24  ;;  %v184_v33 = vsub.f32 %v16_v2, %v66_v7  ;;  %v191_v34 = vsub.f32 %v17_v6, %v69_v10 }
   0x8   :  { %819 = vmatprep.subr.bf16.mxu1 %v950_v21  ;;  %843 = vmatprep.subr.bf16.mxu0 %v950_v21  ;;  %v130_v35 = vand.u32 4294901760, %v959_v25  ;;  %v140_v36 = vand.u32 4294901760, %v962_v26  ;;  %v172_v37 = vsub.f32 %v945_v19, %v171_v27  ;;  %v984_v38 = vsub.f32 %v54_v23, %v965_v28 }
   0x9   :  { %v179_v39 = vsub.f32 %v952_v22, %v178_v31  ;;  %v846_v40 = vpack.c.bf16 %v178_v31, %v171_v27  ;;  %v988_v41 = vsub.f32 %v57_v24, %v976_v32  ;;  %v185_v42 = vand.u32 4294901760, %v184_v33  ;;  %33 = vperm.xlu0 %887, %v23_v29   ;;  %43 = vperm.xlu1 %888, %v25_v30  }
   0xa   :  { %v131_v43 = vsub.f32 %v959_v25, %v130_v35  ;;  %780 = vmatprep.mubr.f32.mxu0 %v130_v35  ;;  %v141_v44 = vsub.f32 %v962_v26, %v140_v36  ;;  %v173_v45 = vand.u32 4294901760, %v172_v37  ;;  %v150_v46 = vand.u32 4294901760, %v984_v38 }
   0xb   :  { %821 = vmatpush3.bf16.msra.mxu1 %v950_v21  ;;  %845 = vmatpush3.bf16.msra.mxu0 %v950_v21  ;;  %v180_v47 = vand.u32 4294901760, %v179_v39  ;;  %v160_v48 = vand.u32 4294901760, %v988_v41  ;;  %v186_v49 = vsub.f32 %v184_v33, %v185_v42  ;;  %v192_v50 = vand.u32 4294901760, %v191_v34 }
   0xc   :  { %v132_v51 = vand.u32 4294901760, %v131_v43  ;;  %v142_v52 = vand.u32 4294901760, %v141_v44  ;;  %847 = vmatprep.subr.bf16.mxu0 %v846_v40  ;;  %v151_v53 = vsub.f32 %v984_v38, %v150_v46  ;;  %v830_v63 = vpack.c.bf16 %v952_v22, %v945_v19 }
   0xd   :  { %v822_v54 = vpack.c.bf16 %v180_v47, %v173_v45  ;;  %v161_v55 = vsub.f32 %v988_v41, %v160_v48  ;;  %v187_v56 = vand.u32 4294901760, %v186_v49  ;;  %v193_v57 = vsub.f32 %v191_v34, %v192_v50 }
   0xe   :  { %738 = vmatprep.mubr.f32.mxu1 %v132_v51  ;;  %781 = vmatmul.mubr.f32.vlgmr.msra.gmra.mrb[0].mxu0 %v140_v36  ;;  %v152_v58 = vand.u32 4294901760, %v151_v53  ;;  %v850_v59 = vpack.c.bf16 %v192_v50, %v185_v42  ;;  %v834_v0 = vpack.c.bf16 %v191_v34, %v184_v33 }
   0xf   :  { %739 = vmatmul.mubr.f32.vlgmr.msra.gmra.mrb[0].mxu1 %v142_v52  ;;  %823 = vmatprep.subr.bf16.mxu1 %v822_v54  ;;  %v162_v60 = vand.u32 4294901760, %v161_v55  ;;  %v194_v61 = vand.u32 4294901760, %v193_v57 }
  0x10   :  { %825 = vmatpush3.bf16.msra.mxu1 %v822_v54  ;;  %849 = vmatpush3.bf16.msra.mxu0 %v846_v40 }
  0x11   :  { %741 = vmatprep.mubr.f32.mxu1 %v152_v58  ;;  %783 = vmatprep.mubr.f32.mxu0 %v150_v46  ;;  %v826_v62 = vpack.c.bf16 %v194_v61, %v187_v56 }
  0x12   :  { %784 = vmatmul.mubr.f32.gmra.mrb[2].mxu0 %v160_v48  ;;  %851 = vmatprep.subr.bf16.mxu0 %v850_v59 }
  0x13   :  { %742 = vmatmul.mubr.f32.gmra.mrb[2].mxu1 %v162_v60  ;;  %827 = vmatprep.subr.bf16.mxu1 %v826_v62 }
  0x14   :  { %829 = vmatpush3.bf16.msra.mxu1 %v826_v62  ;;  %853 = vmatpush3.bf16.msra.mxu0 %v850_v59 }
  0x15   :  { %752 = vmatprep.mubr.f32.mxu1 %v941_v17  ;;  %794 = vmatprep.mubr.f32.mxu0 %v941_v17 }
  0x16   :  { %831 = vmatprep.subr.bf16.mxu1 %v830_v63  ;;  %855 = vmatprep.subr.bf16.mxu0 %v939_v16 }
  0x17   :  { %753 = vmatmul.mubr.f32.vlgmr.msra.gmra.mrb[0].mxu1 %v943_v18  ;;  %795 = vmatmul.mubr.f32.vlgmr.msra.gmra.mrb[0].mxu0 %v943_v18 }
  0x18   :  { %833 = vmatpush3.bf16.msra.mxu1 %v830_v63  ;;  %857 = vmatpush3.bf16.msra.mxu0 %v939_v16 }
  0x19   :  { %755 = vmatprep.mubr.f32.mxu1 %v965_v28  ;;  %797 = vmatprep.mubr.f32.mxu0 %v965_v28 }
  0x1a   :  { %835 = vmatprep.subr.bf16.mxu1 %v834_v0  ;;  %859 = vmatprep.subr.bf16.mxu0 %v950_v21 }
  0x1b   :  { %756 = vmatmul.mubr.f32.gmra.mrb[2].mxu1 %v976_v32  ;;  %798 = vmatmul.mubr.f32.gmra.mrb[2].mxu0 %v976_v32 }
  0x1c   :  { %837 = vmatpush3.bf16.msra.mxu1 %v834_v0  ;;  %861 = vmatpush3.bf16.msra.mxu0 %v950_v21 }
  0x1d   :  { %766 = vmatprep.mubr.f32.mxu1 %v959_v25  ;;  %808 = vmatprep.mubr.f32.mxu0 %v941_v17 }
  0x1f   :  { %767 = vmatmul.mubr.f32.vlgmr.msra.gmra.mrb[0].mxu1 %v962_v26  ;;  %809 = vmatmul.mubr.f32.vlgmr.msra.gmra.mrb[0].mxu0 %v943_v18 }
  0x20   :  { %769 = vmatprep.mubr.f32.mxu1 %v984_v38  ;;  %811 = vmatprep.mubr.f32.mxu0 %v965_v28 }
  0x23   :  { %770 = vmatmul.mubr.f32.gmra.mrb[2].mxu1 %v988_v41  ;;  %812 = vmatmul.mubr.f32.gmra.mrb[2].mxu0 %v976_v32 }
  0x83   :  { %v29_v1 = vpop.permute.xlu0 %28 }
  0x84   :  { %v39_v2 = vpop.permute.xlu1 %38 }
  0x88   :  { %v34_v3 = vpop.permute.xlu0 %33  ;;  %v44_v11 = vpop.permute.xlu1 %43 }
  0xf2   :  { %v768_v4 = vpop.f32.mrb[0].mxu1  ;;  %v810_v5 = vpop.f32.mrb[0].mxu0 }
  0xf3   :  { %v862_v6 = vadd.f32 %v768_v4, %v34_v3  ;;  %v353_v7 = vpop.f32.mrb[1].mxu1  ;;  %v651_v8 = vpop.f32.mrb[1].mxu0 }
  0xf4   :  { %v864_v9 = vadd.f32 %v353_v7, %v29_v1 }
  0xf5   :  { %v863_v10 = vadd.f32 %v862_v6, %v810_v5 }
  0xf6   :  { %v865_v12 = vadd.f32 %v864_v9, %v651_v8  ;;  %v771_v13 = vpop.f32.mrb[2].mxu1  ;;  %v813_v14 = vpop.f32.mrb[2].mxu0 }
  0xf7   :  { %675 = vst.msk [vmem:[%s1039_s3 + $0x8] sm:$0xff] %vm673_vm1, %v863_v10  ;;  %v866_v15 = vadd.f32 %v771_v13, %v44_v11  ;;  %v367_v16 = vpop.f32.mrb[3].mxu1  ;;  %v663_v17 = vpop.f32.mrb[3].mxu0 }
  0xf8   :  { %674 = vst.msk [vmem:[%s1039_s3] sm:$0xff] %vm673_vm1, %v865_v12  ;;  %v868_v18 = vadd.f32 %v367_v16, %v39_v2 }
  0xf9   :  { %v867_v19 = vadd.f32 %v866_v15, %v813_v14 }
  0xfa   :  { %v869_v20 = vadd.f32 %v868_v18, %v663_v17 }
  0xfb   :  { %677 = vst.msk [vmem:[%s1039_s3 + $0x18] sm:$0xff] %vm673_vm1, %v867_v19 }
  0xfc   :  { %676 = vst.msk [vmem:[%s1039_s3 + $0x10] sm:$0xff] %vm673_vm1, %v869_v20 }

</bundles_post_ra>
